<compile_context>
chip_gen: v7x
topology: tpu7x:2x2x1
jax: 0.10.0
libtpu: 0.0.40
codegen_flags: <defaults>
</compile_context>

<pallas_src>
import math

import numpy as np

import jax
import jax.numpy as jnp
from jax.experimental import pallas as pl
from jax.experimental.pallas import tpu as pltpu


# ----------------------------------------------------------------------------
# Interpolation-weight matrices (PyTorch bilinear, align_corners=False,
# recompute_scale_factor=False semantics: ratio = 1/scale_factor)
# ----------------------------------------------------------------------------

def _linear_interp_matrix(in_size, out_size, scale_factor):
    """(out_size, in_size) matrix reproducing PyTorch upsample_bilinear2d along one axis."""
    dst = np.arange(out_size, dtype=np.float64)
    src = (dst + 0.5) / float(scale_factor) - 0.5
    src = np.maximum(src, 0.0)                                  # PyTorch clamps negatives
    i0 = np.minimum(np.floor(src).astype(np.int64), in_size - 1)
    i1 = np.minimum(i0 + 1, in_size - 1)
    w1 = src - i0.astype(np.float64)
    w0 = 1.0 - w1
    a = np.zeros((out_size, in_size), dtype=np.float64)
    rows = dst.astype(np.int64)
    a[rows, i0] += w0
    a[rows, i1] += w1
    return a.astype(np.float32)


def _round_up(x, m):
    return ((x + m - 1) // m) * m


# ----------------------------------------------------------------------------
# Pallas kernel: fused separable bilinear resize for one channel block
# ----------------------------------------------------------------------------

def _resize_kernel(x_ref, aht_ref, awt_ref, o_ref):
    cb, hi, wi = x_ref.shape          # padded sizes (sublane-aligned by the wrapper)
    ho = aht_ref.shape[1]
    wo = awt_ref.shape[1]

    # ---- H-pass: ONE rank-2 MXU matmul (M = cb*Wi, K = Hi, N = Ho). ----
    # Minor-dims transpose (XLU) exposes Hi as the contraction axis; the reshape
    # merging (cb, Wi) is layout-free because Wi is padded to the sublane tile.
    xt = jnp.swapaxes(x_ref[...], 1, 2).reshape(cb * wi, hi)
    u = jnp.dot(xt.astype(jnp.bfloat16), aht_ref[...],
                preferred_element_type=jnp.float32)              # (cb*Wi, Ho) f32

    # ---- W-pass: ONE rank-2 MXU matmul (M = cb*Ho, K = Wi, N = Wo). ----
    ut = jnp.swapaxes(u.reshape(cb, wi, ho), 1, 2).reshape(cb * ho, wi)
    o = jnp.dot(ut.astype(jnp.bfloat16), awt_ref[...],
                preferred_element_type=jnp.float32)              # (cb*Ho, Wo) f32

    o_ref[...] = o.reshape(cb, ho, wo).astype(o_ref.dtype)


# ----------------------------------------------------------------------------
# Padding-aware, generation-aware VMEM budgeting and block selection
# ----------------------------------------------------------------------------

_MIN_GRID_STEPS = 8                   # keep DMA double-buffering busy; lets v7x split across 2 TCs
_TARGET_IO_BLOCK = 2 * 1024 * 1024    # ~2 MiB padded in+out per step is already ~85%+ of roofline


def _padded_bytes(shape, itemsize):
    """VMEM footprint with (sublane, 128-lane) tile padding of the trailing two dims."""
    shape = tuple(int(s) for s in shape)
    sub = 8 if itemsize >= 4 else (16 if itemsize == 2 else 32)
    if len(shape) == 1:
        return _round_up(shape[0] * itemsize, 512)
    lead = 1
    for s in shape[:-2]:
        lead *= s
    return lead * _round_up(shape[-2], sub) * _round_up(shape[-1], 128) * itemsize


def _vmem_budget():
    try:
        cap = int(pltpu.get_tpu_info().vmem_capacity_bytes)
    except Exception:
        cap = 64 * 1024 * 1024                         # conservative: v7x per-TC VMEM
    limit = min(48 * 1024 * 1024, (cap * 5) // 8)      # ~40 MiB on v7x, 48 MiB on v5e/v6e
    budget = (limit * 3) // 5                          # headroom for compiler scratch / spills
    return limit, budget


def _block_vmem_bytes(cb, hi, wi, ho, wo, isz):
    db = 2  # Pallas double-buffers every pipelined block
    io = db * (_padded_bytes((cb, hi, wi), isz) + _padded_bytes((cb, ho, wo), isz))
    wts = db * (_padded_bytes((hi, ho), 2) + _padded_bytes((wi, wo), 2))
    tmp = (_padded_bytes((cb, wi, hi), isz)        # transposed input block
           + _padded_bytes((cb * wi, hi), 2)       # bf16 H-pass LHS
           + _padded_bytes((cb * wi, ho), 4)       # f32 H-pass result
           + _padded_bytes((cb, ho, wi), 4)        # transposed intermediate
           + _padded_bytes((cb * ho, wi), 2)       # bf16 W-pass LHS
           + _padded_bytes((cb * ho, wo), 4))      # f32 W-pass result
    return io + wts + tmp


def _pick_channel_block(m, hi, wi, ho, wo, isz, budget):
    per_io = _padded_bytes((1, hi, wi), isz) + _padded_bytes((1, ho, wo), isz)
    cb = max(1, int(_TARGET_IO_BLOCK // per_io))                       # ~2 MiB I/O blocks
    cb = min(cb, max(1, (m + _MIN_GRID_STEPS - 1) // _MIN_GRID_STEPS))  # grid >= 8 steps when possible
    cb = min(cb, m)
    while cb > 1 and _block_vmem_bytes(cb, hi, wi, ho, wo, isz) > budget:
        cb = max(1, cb // 2)
    return cb


# ----------------------------------------------------------------------------
# Wrapper (NCHW in / NCHW out, matching the PyTorch module)
# ----------------------------------------------------------------------------

def interpolate_bilinear(x, scale):
    """x: NCHW. == F.interpolate(x, scale_factor=scale, mode='bilinear', align_corners=False)."""
    n, c, hi, wi = x.shape
    if isinstance(scale, (tuple, list)):
        sh, sw = float(scale[0]), float(scale[1])
    else:
        sh = sw = float(scale)
    ho = int(math.floor(hi * sh))
    wo = int(math.floor(wi * sw))

    x_isz = int(jnp.dtype(x.dtype).itemsize)
    sub = 8 if x_isz >= 4 else 16                 # sublane tile => layout-free in-kernel reshapes
    hi_p, wi_p = _round_up(hi, sub), _round_up(wi, sub)
    ho_p, wo_p = _round_up(ho, sub), _round_up(wo, sub)

    # Zero-padded interpolation matrices (zero cols => padded input ignored;
    # zero rows => padded output rows are 0 and get sliced off).
    ah = np.zeros((ho_p, hi_p), np.float32)
    ah[:ho, :hi] = _linear_interp_matrix(hi, ho, sh)
    aw = np.zeros((wo_p, wi_p), np.float32)
    aw[:wo, :wi] = _linear_interp_matrix(wi, wo, sw)
    aht = jnp.asarray(ah.T, dtype=jnp.bfloat16)   # (hi_p, ho_p), resident in VMEM
    awt = jnp.asarray(aw.T, dtype=jnp.bfloat16)   # (wi_p, wo_p), resident in VMEM

    m = n * c
    xr = x.reshape(m, hi, wi)
    if (hi_p, wi_p) != (hi, wi):
        xr = jnp.pad(xr, ((0, 0), (0, hi_p - hi), (0, wi_p - wi)))

    vmem_limit, budget = _vmem_budget()
    cb = _pick_channel_block(m, hi_p, wi_p, ho_p, wo_p, x_isz, budget)
    grid = (pl.cdiv(m, cb),)                      # masked tail block if m % cb != 0

    out = pl.pallas_call(
        _resize_kernel,
        out_shape=jax.ShapeDtypeStruct((m, ho_p, wo_p), x.dtype),
        grid_spec=pltpu.PrefetchScalarGridSpec(
            num_scalar_prefetch=0,
            grid=grid,
            in_specs=[
                # pipelined channel blocks; TODO(synk): sweep pipeline_mode=pl.Buffered(3) on v7x
                pl.BlockSpec((cb, hi_p, wi_p), lambda i: (i, 0, 0)),
                pl.BlockSpec((hi_p, ho_p), lambda i: (0, 0)),      # A_h^T resident across steps
                pl.BlockSpec((wi_p, wo_p), lambda i: (0, 0)),      # A_w^T resident across steps
            ],
            out_specs=pl.BlockSpec((cb, ho_p, wo_p), lambda i: (i, 0, 0)),
        ),
        compiler_params=pltpu.CompilerParams(
            dimension_semantics=("parallel",),     # independent blocks -> v7x dual-TC
            vmem_limit_bytes=int(vmem_limit),
        ),
        cost_estimate=pl.CostEstimate(
            flops=int(2 * m * (wi_p * hi_p * ho_p + ho_p * wi_p * wo_p)),
            transcendentals=0,
            bytes_accessed=int(x_isz * (m * hi_p * wi_p + m * ho_p * wo_p)
                               + 2 * (hi_p * ho_p + wi_p * wo_p)),
        ),
    )(xr, aht, awt)

    if (ho_p, wo_p) != (ho, wo):
        out = out[:, :ho, :wo]
    return out.reshape(n, c, ho, wo)


class Interpolate:
    """Pallas port of DSFNet's Interpolate(scale, mode) module."""

    def __init__(self, scale, mode):
        self.scale = scale
        self.mode = mode

    def __call__(self, x):
        if self.mode not in ("bilinear", "linear"):
            # TODO(synk): 'bicubic'/'trilinear' not implemented; 'nearest' is invalid in the
            # original module anyway (it hardcodes align_corners=False, so PyTorch raises).
            raise NotImplementedError(f"Unsupported interpolation mode: {self.mode!r}")
        return interpolate_bilinear(x, self.scale)


# ----------------------------------------------------------------------------
# Independent numpy reference (PyTorch align_corners=False semantics)
# ----------------------------------------------------------------------------

def _reference_bilinear(x_np, scale_h, scale_w):
    n, c, hi, wi = x_np.shape

    def coords(in_size, out_size, scale):
        src = (np.arange(out_size, dtype=np.float64) + 0.5) / float(scale) - 0.5
        src = np.maximum(src, 0.0)
        i0 = np.minimum(np.floor(src).astype(np.int64), in_size - 1)
        i1 = np.minimum(i0 + 1, in_size - 1)
        f1 = src - i0.astype(np.float64)
        f0 = 1.0 - f1
        return i0, i1, f0, f1

    ho = int(math.floor(hi * scale_h))
    wo = int(math.floor(wi * scale_w))
    h0, h1, a0, a1 = coords(hi, ho, scale_h)
    w0, w1, b0, b1 = coords(wi, wo, scale_w)
    xg = x_np.astype(np.float64)
    rows = a0[None, None, :, None] * xg[:, :, h0, :] + a1[None, None, :, None] * xg[:, :, h1, :]
    out = b0[None, None, None, :] * rows[:, :, :, w0] + b1[None, None, None, :] * rows[:, :, :, w1]
    return out.astype(np.float32)


# ----------------------------------------------------------------------------

if __name__ == "__main__":
    key = jax.random.PRNGKey(0)
    k1, k2, k3 = jax.random.split(key, 3)

    # 1) Small NCHW map, aligned sizes, grid of 8 single-channel blocks.
    x1 = jax.random.normal(k1, (2, 4, 16, 16), jnp.float32)
    out1 = jax.jit(Interpolate(scale=2, mode="bilinear"))(x1)
    jax.block_until_ready(out1)
    assert out1.shape == (2, 4, 32, 32), out1.shape
    ref1 = _reference_bilinear(np.asarray(x1), 2.0, 2.0)
    np.testing.assert_allclose(np.asarray(out1), ref1, rtol=2e-2, atol=2e-2)

    # 2) DSFNet-like non-square feature map (exercises multi-channel blocks).
    x2 = jax.random.normal(k2, (2, 32, 24, 40), jnp.float32)
    out2 = jax.jit(Interpolate(scale=2, mode="bilinear"))(x2)
    jax.block_until_ready(out2)
    assert out2.shape == (2, 32, 48, 80), out2.shape
    ref2 = _reference_bilinear(np.asarray(x2), 2.0, 2.0)
    np.testing.assert_allclose(np.asarray(out2), ref2, rtol=2e-2, atol=2e-2)

    # 3) Misaligned spatial sizes + m not divisible by the channel block
    #    (exercises sublane padding and the masked tail grid step).
    x3 = jax.random.normal(k3, (3, 3, 12, 20), jnp.float32)
    out3 = jax.jit(Interpolate(scale=2, mode="bilinear"))(x3)
    jax.block_until_ready(out3)
    assert out3.shape == (3, 3, 24, 40), out3.shape
    ref3 = _reference_bilinear(np.asarray(x3), 2.0, 2.0)
    np.testing.assert_allclose(np.asarray(out3), ref3, rtol=2e-2, atol=2e-2)

    print("KERNEL_OK")
</pallas_src>

<mosaic_0001>
module attributes {stable_mosaic.version = 11 : i64} {
  func.func @_resize_kernel(%arg0: i32, %arg1: memref<1x16x16xf32, #tpu.memory_space<vmem>>, %arg2: memref<16x32xbf16, #tpu.memory_space<vmem>>, %arg3: memref<16x32xbf16, #tpu.memory_space<vmem>>, %arg4: memref<1x32x32xf32, #tpu.memory_space<vmem>>) attributes {dimension_semantics = [#tpu.dimension_semantics<parallel>], iteration_bounds = array<i64: 8>, scalar_prefetch = 0 : i64, scratch_operands = 0 : i64, tpu.core_type = #tpu.core_type<tc>, window_params = [{transform_indices = @transform_0, window_bounds = array<i64: 1, 16, 16>}, {pipeline_mode = #tpu.pipeline_mode<synchronous>, transform_indices = @transform_1, window_bounds = array<i64: 16, 32>}, {pipeline_mode = #tpu.pipeline_mode<synchronous>, transform_indices = @transform_2, window_bounds = array<i64: 16, 32>}, {transform_indices = @transform_3, window_bounds = array<i64: 1, 32, 32>}]} {
    %c0 = arith.constant 0 : index
    %c0_0 = arith.constant 0 : index
    %c0_1 = arith.constant 0 : index
    %0 = vector.load %arg1[%c0, %c0_0, %c0_1] : memref<1x16x16xf32, #tpu.memory_space<vmem>>, vector<1x16x16xf32>
    %1 = tpu.transpose %0, [0, 2, 1] : vector<1x16x16xf32> -> vector<1x16x16xf32>
    %2 = vector.shape_cast %1 : vector<1x16x16xf32> to vector<16x16xf32>
    %3 = arith.truncf %2 : vector<16x16xf32> to vector<16x16xbf16>
    %c0_2 = arith.constant 0 : index
    %c0_3 = arith.constant 0 : index
    %4 = vector.load %arg2[%c0_2, %c0_3] : memref<16x32xbf16, #tpu.memory_space<vmem>>, vector<16x32xbf16>
    %cst = arith.constant dense<0.000000e+00> : vector<16x32xf32>
    %5 = tpu.matmul %3, %4, %cst {dimension_numbers = #tpu.dot_dimension_numbers<[1], [0], [0], [1], [0, 0, 1, 1], [], []>} : vector<16x16xbf16>, vector<16x32xbf16>, vector<16x32xf32> -> vector<16x32xf32>
    %6 = vector.shape_cast %5 : vector<16x32xf32> to vector<1x16x32xf32>
    %7 = tpu.transpose %6, [0, 2, 1] : vector<1x16x32xf32> -> vector<1x32x16xf32>
    %8 = vector.shape_cast %7 : vector<1x32x16xf32> to vector<32x16xf32>
    %9 = arith.truncf %8 : vector<32x16xf32> to vector<32x16xbf16>
    %c0_4 = arith.constant 0 : index
    %c0_5 = arith.constant 0 : index
    %10 = vector.load %arg3[%c0_4, %c0_5] : memref<16x32xbf16, #tpu.memory_space<vmem>>, vector<16x32xbf16>
    %cst_6 = arith.constant dense<0.000000e+00> : vector<32x32xf32>
    %11 = tpu.matmul %9, %10, %cst_6 {dimension_numbers = #tpu.dot_dimension_numbers<[1], [0], [0], [1], [0, 0, 1, 1], [], []>} : vector<32x16xbf16>, vector<16x32xbf16>, vector<32x32xf32> -> vector<32x32xf32>
    %12 = vector.shape_cast %11 : vector<32x32xf32> to vector<1x32x32xf32>
    %c0_7 = arith.constant 0 : index
    %c0_8 = arith.constant 0 : index
    %c0_9 = arith.constant 0 : index
    %13 = vector.load %arg4[%c0_7, %c0_8, %c0_9] : memref<1x32x32xf32, #tpu.memory_space<vmem>>, vector<1x32x32xf32>
    tpu.vector_store %arg4[%c0_7, %c0_8, %c0_9], %12 {strides = array<i32>} : memref<1x32x32xf32, #tpu.memory_space<vmem>>, vector<1x32x32xf32>,
    return
  }
  func.func @transform_0(%arg0: i32) -> (i32, i32, i32) {
    %c0_i32 = arith.constant 0 : i32
    %c0_i32_0 = arith.constant 0 : i32
    %c0_i32_1 = arith.constant 0 : i32
    return %arg0, %c0_i32, %c0_i32_0 : i32, i32, i32
  }
  func.func @transform_1(%arg0: i32) -> (i32, i32) {
    %c0_i32 = arith.constant 0 : i32
    %c0_i32_0 = arith.constant 0 : i32
    %c0_i32_1 = arith.constant 0 : i32
    return %c0_i32, %c0_i32_0 : i32, i32
  }
  func.func @transform_2(%arg0: i32) -> (i32, i32) {
    %c0_i32 = arith.constant 0 : i32
    %c0_i32_0 = arith.constant 0 : i32
    %c0_i32_1 = arith.constant 0 : i32
    return %c0_i32, %c0_i32_0 : i32, i32
  }
  func.func @transform_3(%arg0: i32) -> (i32, i32, i32) {
    %c0_i32 = arith.constant 0 : i32
    %c0_i32_0 = arith.constant 0 : i32
    %c0_i32_1 = arith.constant 0 : i32
    return %arg0, %c0_i32, %c0_i32_0 : i32, i32, i32
  }
}

</mosaic_0001>

<bundles_post_ra>
// kernel: _unnamed_function_.1
= control target key start
LH: loop header
LB: loop body
LE: loop exit
PB: predicated region body
PF: predicated region fallthrough
CT: control target
= control target key end

     0   :  { %8 = vsyncpa [#allocation3], 0  ;;  %s855_s0 = inlined_call_operand.hbm [shape: f32[8,16,16], index: 0, kind: input, shape index: {}]   ;;  %s856_s1 = inlined_call_operand.vmem [shape: bf16[16,32], index: 1, kind: input, shape index: {}, may-alias: {1,2}]   ;;  %s857_s2 = inlined_call_operand.vmem [shape: bf16[16,32], index: 2, kind: input, shape index: {}, may-alias: {1,2}]   ;;  %s858_s3 = inlined_call_operand.hbm [shape: f32[8,32,32], index: 3, kind: output, shape index: {}]  }
   0x1   :  { %10 = vsyncpa [#allocation3 + $0x1], 0 }
   0x2   :  { %11 = vsyncpa [#allocation4], 0 }
   0x3   :  { %13 = vsyncpa [#allocation4 + $0x1], 0  ;;  %s685_s12 = smov 0   ;;  %s687_s13 = smov 0  }
   0x4   :  { %s689_s14 = smov 0   ;;  %s691_s15 = smov 0  }
   0x5 LB: > { %s706_s16 = sadd.s32 4294967295, %s655_s15   ;;  %s467_s17 = sadd.s32 4294967294, %s655_s15   ;;  %s655_s15 = sphi %s691_s15, %s870_s15   ;;  %s651_s14 = sphi %s689_s14, %s869_s14   ;;  %s647_s13 = sphi %s687_s13, %s868_s13   ;;  %s643_s12 = sphi %s685_s12, %s867_s12  }
   0x6   : > { %s710_s18 = sadd.s32 1, %s655_s15   ;;  %s26_s19 = sadd.s32 1, %s651_s14 }
   0x7   : > { %s23_s20 = ssub.s32 %s655_s15, %s710_s18  ;;  %p33_p0 = scmp.ne.s32.totalorder %s651_s14, %s647_s13 }
   0x8   : > { %p24_p1 = scmp.eq.s32.totalorder %s23_s20, 0  ;;  %p34_p2 = scmp.eq.s32.totalorder %s655_s15, 0 }
   0x9   : > { %p39_p3 = scmp.ne.s32.totalorder %s647_s13, %s643_s12  ;;  %p40_p4 = scmp.eq.s32.totalorder %s706_s16, 0 }
   0xa   : > { %s722_s21 = scalar_select %p24_p1, %s651_s14, %s26_s19  }
   0xb   : > { %p724_p5 = por %p34_p2, %p33_p0  ;;  %p728_p6 = por %p40_p4, %p39_p3 }
   0xc   : > { %p105_p7 = scmp.eq.s32.totalorder %s706_s16, 7  ;;  %p111_p8 = scmp.eq.s32.totalorder %s467_s17, 7 }
   0xd   : > { %p517_p9 = scmp.lt.s32.totalorder %s655_s15, 8  ;;  %s137_s26 = sand.u32 1, %s651_s14  }
   0xe   : > { %p734_p10 = por %p105_p7, %p33_p0  ;;  %p738_p11 = por %p111_p8, %p39_p3 }
   0xf   : > { %s486_s27 = sshll.u32 %s655_s15, 8  ;;  %s470_s28 = sshll.u32 %s137_s26, 4 }
  0x10   : > { %s862_s24 = scalar_select %p734_p10, 1, 0 }
  0x11   : > { %s863_s25 = scalar_select %p738_p11, 1, 0 }
  0x12   : > { %s747_s4 = scalar_lea.hbm %s855_s0, %s486_s27  ;;  %s141_s5 = scalar_lea.vmem [#allocation2], %s470_s28 }
  0x13   : > { %s148_s6 = sshll.u32 %s141_s5, 4  ;;  %p751_p12 = pnand %p517_p9, %p724_p5  ;;  %s755_s6 = int_to_ptr.vmem [resolvable:$true] %s148_s6 }
  0x14   : > { %s757_s8 = scalar_lea.sflag [#allocation3], %s137_s26  ;;  %s559_s9 = scalar_lea.hbm %s747_s4, 256 }
  0x15   : > { %p560_p13 = scmp.ne.s32.totalorder %s747_s4, %s559_s9  ;;  %p561_p0 = pneg %p751_p12 }
  0x16   : > { %s564_s17 = scalar_lea.hbm %s855_s0, 2048  ;;  %p565_p3 = scmp.lt.u32.totalorder %s747_s4, %s855_s0 }
  0x17   : > { %p562_p1 = pnand %p561_p0, %p560_p13  ;;  %p566_p4 = scmp.lt.u32.totalorder %s564_s17, %s559_s9 }
  0x18   : > { %p568_p7 = scmp.lt.u32.totalorder %s559_s9, %s747_s4 }
  0x19   : > { %p563_p2 = pneg %p562_p1  ;;  %p567_p5 = por %p566_p4, %p565_p3 }
  0x1b   : > { %p569_p8 = por %p568_p7, %p567_p5 }
  0x1d   : > { %p570_p9 = pnand %p569_p8, %p563_p2 }
  0x1f   : > { %573 = shalt.err (!%p570_p9)
}
  0x20   : > { %s574_s22 = scalar_lea.vmem %s755_s6, 256  ;;  %s657_s26 = smov [#allocation2]  }
  0x21   : > { %p575_p13 = scmp.ne.s32.totalorder %s755_s6, %s574_s22  ;;  %s579_s27 = sshll.u32 %s657_s26, 4  ;;  %s580_s27 = int_to_ptr.vmem [resolvable:$false] %s579_s27 }
  0x22   : > { %s581_s28 = scalar_lea.vmem %s580_s27, 512  ;;  %p582_p10 = scmp.lt.s32.totalorder %s755_s6, %s580_s27 }
  0x23   : > { %p577_p1 = pnand %p575_p13, %p561_p0  ;;  %p583_p3 = scmp.lt.s32.totalorder %s581_s28, %s574_s22 }
  0x25   : > { %p578_p11 = pneg %p577_p1  ;;  %p584_p4 = por %p583_p3, %p582_p10 }
  0x27   : > { %p585_p5 = pnand %p584_p4, %p578_p11 }
  0x29   : > { %588 = shalt.err (!%p585_p5)
}
  0x2a   : > { %s658_s29 = smov 128   ;;  %s659_s30 = smov 8  }
  0x2b   : > { %512 = dma.hbm_to_vmem [thread:$0]  (!%p751_p12), %s747_s4, 256, %s755_s6, %s757_s8, %s658_s29, %s658_s29, %s659_s30  }
  0x2c   : > { %p473_p0 = scmp.ge.s32.totalorder %s655_s15, 1  ;;  %p156_p2 = scmp.lt.s32.totalorder %s655_s15, 9 }
  0x2e   : > { %p157_p7 = pnand %p473_p0, %p156_p2 }
  0x2f   : > { %s788_s5 = sand.u32 (!%p157_p7), 1, %s647_s13  }
  0x30   : > { %160 = sbr.rel (%p157_p7) target bundleno = 777 (0x309), region = 32  ;;  %s474_s9 = sshll.u32 (!%p157_p7), %s788_s5, 4 }
  0x31   : > { %s163_s10 = scalar_lea.sflag (!%p157_p7), [#allocation3], %s788_s5  ;;  %s166_s11 = scalar_lea.vmem (!%p157_p7), [#allocation2], %s474_s9 }
  0x37   : > { %634 = dma.done.wait (%p728_p6), %s163_s10, 256  }
  0x38   : > { %636 = vsyncadd (%p728_p6), %s163_s10, 4294967040  ;;  %v190_v0 = vld [vmem:[%s166_s11] sm:$0xff]  ;;  %v191_v2 = vld [vmem:[%s166_s11 + $0x8] sm:$0xff]  ;;  %v660_v3 = vmov 0.0   ;;  %vm661_vm0 = vmmov 0   ;;  %vm233_vm1 = vcmask 130048  }
  0x39   : > { %192 = vxpose.xlu0.b32.start [1/2] (short) (narrow) %v190_v0, 16  ;;  %v557_v1 = vld [vmem:[%s856_s1] sm:$0xff]   ;;  %493 = vmatprep.subr.bf16.mxu0 %v660_v3  ;;  %s475_s8 = sshll.u32 %s788_s5, 5  ;;  %vm375_vm2 = vcmask 261120   ;;  %s487_s20 = sshll.u32 %s706_s16, 9 }
  0x3a   : > { %494 = vmatpush3.bf16.msra.mxu0 %v557_v1  ;;  %495 = vmatprep.mubr.msk.bf16.mxu0 %vm661_vm0, %v660_v3  ;;  %v558_v11 = vld [vmem:[%s857_s2] sm:$0xff]   ;;  %s188_s17 = scalar_lea.vmem [#allocation5], %s475_s8  ;;  %s812_s27 = scalar_lea.hbm %s858_s3, %s487_s20 }
  0x3b   : > { %499 = vmatprep.subr.bf16.mxu1 %v558_v11  ;;  %s394_s19 = sshll.u32 %s188_s17, 4  ;;  %s381_s28 = scalar_lea.sflag [#allocation4], %s788_s5  ;;  %s807_s19 = int_to_ptr.vmem [resolvable:$true] %s394_s19 }
  0x3c   : > { %500 = vmatpush3.bf16.msra.mxu1 %v558_v11  ;;  %s589_s16 = scalar_lea.vmem %s807_s19, 512  ;;  %p865_p10 = scmp.ne.s32.totalorder %s862_s24, 0 }
  0x3d   : > { %193 = vxpose.xlu0.b32.end [2/2] (short) (narrow) %v191_v2, 16  ;;  %p590_p6 = scmp.ne.s32.totalorder %s807_s19, %s589_s16  ;;  %s662_s29 = smov [#allocation5]  }
  0x3e   : > { %s593_s30 = sshll.u32 %s662_s29, 4  ;;  %s594_s30 = int_to_ptr.vmem [resolvable:$false] %s593_s30 }
  0x3f   : > { %p591_p11 = pnand %p590_p6, %p865_p10  ;;  %s595_s9 = scalar_lea.vmem %s594_s30, 1024 }
  0x40   : > { %p596_p8 = scmp.lt.s32.totalorder %s807_s19, %s594_s30  ;;  %p597_p9 = scmp.lt.s32.totalorder %s595_s9, %s589_s16 }
  0x41   : > { %p592_p12 = pneg %p591_p11 }
  0x42   : > { %p598_p13 = por %p597_p9, %p596_p8 }
  0x44   : > { %p599_p1 = pnand %p598_p13, %p592_p12 }
  0xb9   : > { %v208_v4 = vpop.trf.xlu0 }
  0xbd   : > { %v209_v5 = vpop.trf.xlu0 }
  0xbe   : > { %v224_v6 = vpack.c.bf16 %v209_v5, %v208_v4 }
  0xc0   : > { %496 = vmatmul.mubr.msk.bf16.vlgmr.msra.gmra.mrb[0].mxu0 %vm233_vm1, %v224_v6 }
 0x193   : > { %v271_v7 = vpop.f32.mrb[0].mxu0 }
 0x194   : > { %278 = vxpose.xlu1.b32.start [1/2] (short) (narrow) %v271_v7, 32  ;;  %v497_v8 = vpop.f32.mrb[1].mxu0 }
 0x195   : > { %v274_v9 = vpop.f32.mrb[2].mxu0 }
 0x196   : > { %v498_v10 = vpop.f32.mrb[3].mxu0 }
 0x198   : > { %279 = vxpose.xlu1.b32.end [2/2] (short) (narrow) %v274_v9, 32 }
 0x214   : > { %v294_v12 = vpop.trf.xlu1 }
 0x218   : > { %v295_v13 = vpop.trf.xlu1 }
 0x219   : > { %v310_v14 = vpack.c.bf16 %v295_v13, %v294_v12 }
 0x21b   : > { %501 = vmatprep.mubr.msk.bf16.mxu1 %vm233_vm1, %v310_v14 }
 0x21c   : > { %v296_v15 = vpop.trf.xlu1 }
 0x220   : > { %v297_v16 = vpop.trf.xlu1 }
 0x221   : > { %v311_v17 = vpack.c.bf16 %v297_v16, %v296_v15 }
 0x223   : > { %502 = vmatmul.mubr.msk.bf16.vlgmr.msra.gmra.mrb[0].mxu1 %vm233_vm1, %v311_v17 }
 0x2f6   : > { %v503_v18 = vpop.f32.mrb[0].mxu1 }
 0x2f7   : > { %378 = vst.msk [vmem:[%s188_s17 + $0x10] sm:$0xff] %vm375_vm2, %v503_v18  ;;  %v360_v19 = vpop.f32.mrb[1].mxu1 }
 0x2f8   : > { %376 = vst.msk [vmem:[%s188_s17] sm:$0xff] %vm375_vm2, %v360_v19  ;;  %v504_v20 = vpop.f32.mrb[2].mxu1 }
 0x2f9   : > { %379 = vst.msk [vmem:[%s188_s17 + $0x18] sm:$0xff] %vm375_vm2, %v504_v20  ;;  %v363_v21 = vpop.f32.mrb[3].mxu1 }
 0x2fa   : > { %377 = vst.msk [vmem:[%s188_s17 + $0x8] sm:$0xff] %vm375_vm2, %v363_v21 }
 0x2fb   : > { %602 = shalt.err (!%p599_p1)
}
 0x2fc   : > { %s603_s10 = scalar_lea.hbm %s812_s27, 512  ;;  %s607_s6 = scalar_lea.hbm %s858_s3, 4096 }
 0x2fd   : > { %p604_p3 = scmp.ne.s32.totalorder %s812_s27, %s603_s10  ;;  %p608_p0 = scmp.lt.u32.totalorder %s812_s27, %s858_s3 }
 0x2fe   : > { %p609_p2 = scmp.lt.u32.totalorder %s607_s6, %s603_s10  ;;  %p611_p6 = scmp.lt.u32.totalorder %s603_s10, %s812_s27 }
 0x2ff   : > { %p605_p4 = pnand %p604_p3, %p865_p10 }
 0x300   : > { %p610_p7 = por %p609_p2, %p608_p0 }
 0x301   : > { %p606_p5 = pneg %p605_p4 }
 0x302   : > { %p612_p11 = por %p611_p6, %p610_p7 }
 0x304   : > { %p613_p12 = pnand %p612_p11, %p606_p5 }
 0x306   : > { %616 = shalt.err (!%p613_p12)
}
 0x307   : > { %s663_s8 = smov 128   ;;  %s664_s17 = smov 8  }
 0x308   : > { %507 = dma.vmem_to_hbm [thread:$0]  (%p865_p10), %s807_s19, 512, %s812_s27, %s381_s28, %s663_s8, %s663_s8, %s664_s17  }
 0x309 PF: > { %p518_p8 = scmp.ge.s32.totalorder %s655_s15, 2  ;;  %s409_s20 = sand.u32 1, %s643_s12  }
 0x30a   : > { %p866_p9 = scmp.ne.s32.totalorder %s863_s25, 0  ;;  %s410_s22 = scalar_lea.sflag [#allocation4], %s409_s20 }
 0x30c   : > { %p514_p13 = pnand %p518_p8, %p866_p9 }
 0x30e   : > { %638 = dma.done.wait (!%p514_p13), %s410_s22, 512  }
 0x30f   : > { %640 = vsyncadd (!%p514_p13), %s410_s22, 4294966784  ;;  %p16_p1 = scmp.ge.s32.totalorder %s710_s18, 10   ;;  %s867_s12 = smov %s647_s13 }
 0x310   : > { %s868_s13 = smov %s651_s14  ;;  %s869_s14 = smov %s722_s21 }
 0x311   : > { %s870_s15 = smov %s710_s18  ;;  %18 = sbr.rel (!%p16_p1) target bundleno = 5 (0x5), region = 77 }
 0x318   :  { %415 = vsyncpa [#allocation3], 1 }
 0x319   :  { %417 = vsyncpa [#allocation3 + $0x1], 1 }
 0x31a   :  { %418 = vsyncpa [#allocation4], 1 }
 0x31b   :  { %420 = vsyncpa [#allocation4 + $0x1], 1 }

</bundles_post_ra>
